<compile_context>
chip_gen: v5e
topology: v5e:2x2
jax: 0.10.0
libtpu: 0.0.40
codegen_flags: <defaults>
</compile_context>

<pallas_src>
import functools

import jax
import jax.numpy as jnp
from jax import lax
from jax.experimental import pallas as pl
from jax.experimental.pallas import tpu as pltpu


def _dice_stats_kernel(score_ref, tgt_ref, out_ref,
                       inter_acc, z_acc, y_acc,
                       *, apply_softmax, hw):
    """Accumulate per-class dice statistics over pixel tiles of one batch item.

    score_ref : (C, T) prediction tile (native dtype; cast to f32 in-kernel)
    tgt_ref   : (1, T) class-index tile (native dtype)
    out_ref   : (C, 3) per-batch-item output, columns = [intersect, z_sum, y_sum]
    *_acc     : (C, 128) f32 per-lane partial-sum accumulators (VMEM scratch)
    """
    p = pl.program_id(1)
    c, tile = score_ref.shape
    assert tile % 128 == 0

    @pl.when(p == 0)
    def _():
        inter_acc[...] = jnp.zeros_like(inter_acc)
        z_acc[...] = jnp.zeros_like(z_acc)
        y_acc[...] = jnp.zeros_like(y_acc)

    score = score_ref[...].astype(jnp.float32)          # (C, T)
    tgt = tgt_ref[...]                                  # (1, T) native dtype

    # Ragged tail: hw may not be a multiple of the tile; lanes beyond the real
    # pixel count hold unspecified data and must be masked out.
    ragged = (hw % tile) != 0
    if ragged:
        lane = lax.broadcasted_iota(jnp.int32, (1, tile), 1)
        valid = (p * tile + lane) < hw                  # (1, T) bool
    else:
        valid = None

    if apply_softmax:
        if valid is not None:
            # keep garbage (possibly inf/nan) lanes out of exp/sum
            score = jnp.where(valid, score, 0.0)
        m = jnp.max(score, axis=0, keepdims=True)
        e = jnp.exp(score - m)                          # EUP
        # NOTE: approx=True would move the divide fully to the EUP, but the
        # kernel is HBM-bound and the exact reciprocal keeps bit-level
        # fidelity with the reference self-test.
        score = e * pl.reciprocal(jnp.sum(e, axis=0, keepdims=True), approx=False)

    if valid is not None:
        score = jnp.where(valid, score, 0.0)

    # One-hot of the target against the class (sublane) index; compare in the
    # target's native numeric domain.
    if jnp.issubdtype(tgt.dtype, jnp.floating):
        ids = lax.broadcasted_iota(jnp.int32, (c, tile), 0).astype(jnp.float32)
        onehot = tgt.astype(jnp.float32) == ids
    else:
        ids = lax.broadcasted_iota(jnp.int32, (c, tile), 0)
        onehot = tgt.astype(jnp.int32) == ids
    if valid is not None:
        onehot = jnp.logical_and(onehot, valid)
    onehot = onehot.astype(jnp.float32)                 # (C, T)

    def lane_fold(x):                                   # (C, T) -> (C, 128)
        # Lane-tile-aligned static slices + VALU adds only (no XLU per tile).
        acc = x[:, 0:128]
        for j in range(1, tile // 128):
            acc = acc + x[:, j * 128:(j + 1) * 128]
        return acc

    inter_acc[...] += lane_fold(score * onehot)
    z_acc[...] += lane_fold(score * score)
    y_acc[...] += lane_fold(onehot)                     # onehot^2 == onehot

    # Single cross-lane reduce + single store per batch item.
    @pl.when(p == pl.num_programs(1) - 1)
    def _():
        stats = jnp.concatenate(
            [jnp.sum(inter_acc[...], axis=1, keepdims=True),
             jnp.sum(z_acc[...], axis=1, keepdims=True),
             jnp.sum(y_acc[...], axis=1, keepdims=True)],
            axis=1)                                     # (C, 3)
        out_ref[...] = stats


def _pick_tile(hw, c, score_itemsize, tgt_itemsize,
               min_tile=512, max_tile=8192, vmem_budget=8 * 1024 * 1024):
    """Pick a pixel tile (multiple of 128) that keeps the double-buffered DMA
    blocks plus the f32 elementwise temporaries well under the default scoped
    VMEM limit on all generations (v5e 16 MiB, v6e/v7x 32 MiB)."""
    per_pix = 2 * (c * score_itemsize + tgt_itemsize) + 16 * c
    tile = vmem_budget // per_pix
    tile = max(min_tile, min(max_tile, tile))
    tile = max(128, (tile // 128) * 128)
    hw_pad = ((hw + 127) // 128) * 128                  # don't exceed the row
    return int(min(tile, hw_pad))


def dice_loss(inputs, target, weight=None, softmax=False, *, tile_pixels=None):
    """Pallas implementation of DiceLoss.forward.

    inputs : (N, C, H, W) predictions (any float dtype)
    target : (N, 1, H, W) class indices (float or int dtype)
    """
    N, C, H, W = inputs.shape
    hw = H * W

    score = inputs.reshape(N, C, hw)                    # free reshape, native dtype
    tgt = target.reshape(N, 1, hw)                      # native dtype

    if tile_pixels is None:
        tile_pixels = _pick_tile(hw, C, score.dtype.itemsize, tgt.dtype.itemsize)
    tile = int(tile_pixels)
    assert tile % 128 == 0, "tile_pixels must be a multiple of 128"
    n_tiles = pl.cdiv(hw, tile)

    kernel = functools.partial(_dice_stats_kernel, apply_softmax=softmax, hw=hw)

    stats = pl.pallas_call(
        kernel,
        out_shape=jax.ShapeDtypeStruct((N, C, 3), jnp.float32),
        grid_spec=pltpu.PrefetchScalarGridSpec(
            num_scalar_prefetch=0,
            grid=(N, n_tiles),
            in_specs=[
                pl.BlockSpec((None, C, tile), lambda n, p: (n, 0, p)),
                pl.BlockSpec((None, 1, tile), lambda n, p: (n, 0, p)),
            ],
            out_specs=pl.BlockSpec((None, C, 3), lambda n, p: (n, 0, 0)),
            scratch_shapes=[
                pltpu.VMEM((C, 128), jnp.float32),
                pltpu.VMEM((C, 128), jnp.float32),
                pltpu.VMEM((C, 128), jnp.float32),
            ],
        ),
        compiler_params=pltpu.CompilerParams(
            dimension_semantics=("parallel", "arbitrary")),
    )(score, tgt)                                       # (N, C, 3)

    total = jnp.sum(stats, axis=0)                      # (C, 3)
    intersect, z_sum, y_sum = total[:, 0], total[:, 1], total[:, 2]

    smooth = 1e-5
    dice = 1.0 - (2.0 * intersect + smooth) / (z_sum + y_sum + smooth)

    if weight is None:
        weight = jnp.ones((C,), jnp.float32)
    else:
        weight = jnp.asarray(weight, jnp.float32)
    return jnp.sum(dice * weight) / C


def _dice_loss_ref(inputs, target, weight=None, softmax=False):
    """Pure-JAX reference mirroring the PyTorch module exactly."""
    N, C, H, W = inputs.shape
    x = inputs.astype(jnp.float32)
    if softmax:
        x = jax.nn.softmax(x, axis=1)
    tgt = target.astype(jnp.float32)
    onehot = jnp.concatenate(
        [(tgt == i).astype(jnp.float32) for i in range(C)], axis=1)  # (N, C, H, W)
    if weight is None:
        weight = [1.0] * C
    smooth = 1e-5
    loss = 0.0
    for i in range(C):
        s = x[:, i]
        t = onehot[:, i]
        intersect = jnp.sum(s * t)
        y_sum = jnp.sum(t * t)
        z_sum = jnp.sum(s * s)
        dice = 1.0 - (2.0 * intersect + smooth) / (z_sum + y_sum + smooth)
        loss = loss + dice * weight[i]
    return loss / C


if __name__ == "__main__":
    key = jax.random.PRNGKey(0)
    k1, k2, k3, k4 = jax.random.split(key, 4)

    N, C, H, W = 2, 4, 16, 16
    logits = jax.random.normal(k1, (N, C, H, W), jnp.float32)
    probs = jax.nn.softmax(logits, axis=1)
    target = jax.random.randint(k2, (N, 1, H, W), 0, C).astype(jnp.float32)

    # 1) probabilities already given (softmax=False)
    out = jax.block_until_ready(dice_loss(probs, target, weight=None, softmax=False))
    ref = _dice_loss_ref(probs, target, weight=None, softmax=False)
    assert jnp.allclose(out, ref, rtol=1e-5, atol=1e-5), (out, ref)

    # 2) in-kernel softmax path
    out_sm = jax.block_until_ready(dice_loss(logits, target, softmax=True))
    ref_sm = _dice_loss_ref(logits, target, softmax=True)
    assert jnp.allclose(out_sm, ref_sm, rtol=1e-5, atol=1e-5), (out_sm, ref_sm)

    # 3) ragged pixel tail (H*W not a multiple of the tile), int32 targets,
    #    explicit class weights, explicit small tile to force >1 pixel tile.
    H2, W2 = 16, 12                                   # hw = 192
    logits2 = jax.random.normal(k3, (N, C, H2, W2), jnp.float32)
    probs2 = jax.nn.softmax(logits2, axis=1)
    target2 = jax.random.randint(k4, (N, 1, H2, W2), 0, C)  # int32
    wts = [0.5, 1.0, 2.0, 1.5]
    out_r = jax.block_until_ready(
        dice_loss(probs2, target2, weight=wts, softmax=False, tile_pixels=128))
    ref_r = _dice_loss_ref(probs2, target2, weight=wts, softmax=False)
    assert jnp.allclose(out_r, ref_r, rtol=1e-5, atol=1e-5), (out_r, ref_r)

    print("KERNEL_OK")
</pallas_src>

<mosaic_0001>
module attributes {stable_mosaic.version = 11 : i64} {
  func.func @_dice_stats_kernel(%arg0: i32, %arg1: i32, %arg2: memref<1x4x256xf32, #tpu.memory_space<vmem>>, %arg3: memref<1x1x256xf32, #tpu.memory_space<vmem>>, %arg4: memref<1x4x3xf32, #tpu.memory_space<vmem>>, %arg5: memref<4x128xf32, #tpu.memory_space<vmem>>, %arg6: memref<4x128xf32, #tpu.memory_space<vmem>>, %arg7: memref<4x128xf32, #tpu.memory_space<vmem>>) attributes {dimension_semantics = [#tpu.dimension_semantics<parallel>, #tpu.dimension_semantics<arbitrary>], iteration_bounds = array<i64: 2, 1>, scalar_prefetch = 0 : i64, scratch_operands = 3 : i64, tpu.core_type = #tpu.core_type<tc>, window_params = [{transform_indices = @transform_0, window_bounds = array<i64: 1, 4, 256>}, {transform_indices = @transform_1, window_bounds = array<i64: 1, 1, 256>}, {transform_indices = @transform_2, window_bounds = array<i64: 1, 4, 3>}]} {
    %c0_i32 = arith.constant 0 : i32
    %0 = arith.cmpi eq, %arg1, %c0_i32 : i32
    %1 = arith.extui %0 : i1 to i32
    %c0_i32_0 = arith.constant 0 : i32
    %2 = arith.cmpi ne, %1, %c0_i32_0 : i32
    scf.if %2 {
      %cst = arith.constant 0.000000e+00 : f32
      %36 = vector.broadcast %cst : f32 to vector<4x128xf32>
      %c0_20 = arith.constant 0 : index
      %c0_21 = arith.constant 0 : index
      %37 = vector.load %arg5[%c0_20, %c0_21] : memref<4x128xf32, #tpu.memory_space<vmem>>, vector<4x128xf32>
      tpu.vector_store %arg5[%c0_20, %c0_21], %36 {strides = array<i32>} : memref<4x128xf32, #tpu.memory_space<vmem>>, vector<4x128xf32>,
      %cst_22 = arith.constant 0.000000e+00 : f32
      %38 = vector.broadcast %cst_22 : f32 to vector<4x128xf32>
      %c0_23 = arith.constant 0 : index
      %c0_24 = arith.constant 0 : index
      %39 = vector.load %arg6[%c0_23, %c0_24] : memref<4x128xf32, #tpu.memory_space<vmem>>, vector<4x128xf32>
      tpu.vector_store %arg6[%c0_23, %c0_24], %38 {strides = array<i32>} : memref<4x128xf32, #tpu.memory_space<vmem>>, vector<4x128xf32>,
      %cst_25 = arith.constant 0.000000e+00 : f32
      %40 = vector.broadcast %cst_25 : f32 to vector<4x128xf32>
      %c0_26 = arith.constant 0 : index
      %c0_27 = arith.constant 0 : index
      %41 = vector.load %arg7[%c0_26, %c0_27] : memref<4x128xf32, #tpu.memory_space<vmem>>, vector<4x128xf32>
      tpu.vector_store %arg7[%c0_26, %c0_27], %40 {strides = array<i32>} : memref<4x128xf32, #tpu.memory_space<vmem>>, vector<4x128xf32>,
    } else {
    }
    %c0 = arith.constant 0 : index
    %c0_1 = arith.constant 0 : index
    %c0_2 = arith.constant 0 : index
    %3 = vector.load %arg2[%c0, %c0_1, %c0_2] : memref<1x4x256xf32, #tpu.memory_space<vmem>>, vector<1x4x256xf32>
    %4 = vector.shape_cast %3 : vector<1x4x256xf32> to vector<4x256xf32>
    %c0_3 = arith.constant 0 : index
    %c0_4 = arith.constant 0 : index
    %c0_5 = arith.constant 0 : index
    %5 = vector.load %arg3[%c0_3, %c0_4, %c0_5] : memref<1x1x256xf32, #tpu.memory_space<vmem>>, vector<1x1x256xf32>
    %6 = vector.shape_cast %5 : vector<1x1x256xf32> to vector<1x256xf32>
    %7 = tpu.iota {dimensions = array<i32: 0>} : vector<4x256xi32>
    %8 = arith.sitofp %7 : vector<4x256xi32> to vector<4x256xf32>
    %9 = vector.broadcast %6 : vector<1x256xf32> to vector<4x256xf32>
    %10 = arith.cmpf oeq, %9, %8 : vector<4x256xf32>
    %11 = arith.extui %10 : vector<4x256xi1> to vector<4x256xi32>
    %12 = arith.sitofp %11 : vector<4x256xi32> to vector<4x256xf32>
    %c0_6 = arith.constant 0 : index
    %c0_7 = arith.constant 0 : index
    %13 = vector.load %arg5[%c0_6, %c0_7] : memref<4x128xf32, #tpu.memory_space<vmem>>, vector<4x128xf32>
    %14 = arith.mulf %4, %12 : vector<4x256xf32>
    %15 = vector.extract_strided_slice %14 {offsets = [0, 0], sizes = [4, 128], strides = [1, 1]} : vector<4x256xf32> to vector<4x128xf32>
    %16 = vector.extract_strided_slice %14 {offsets = [0, 128], sizes = [4, 128], strides = [1, 1]} : vector<4x256xf32> to vector<4x128xf32>
    %17 = arith.addf %15, %16 : vector<4x128xf32>
    %18 = arith.addf %13, %17 : vector<4x128xf32>
    %c0_8 = arith.constant 0 : index
    %c0_9 = arith.constant 0 : index
    %19 = vector.load %arg5[%c0_8, %c0_9] : memref<4x128xf32, #tpu.memory_space<vmem>>, vector<4x128xf32>
    tpu.vector_store %arg5[%c0_8, %c0_9], %18 {strides = array<i32>} : memref<4x128xf32, #tpu.memory_space<vmem>>, vector<4x128xf32>,
    %c0_10 = arith.constant 0 : index
    %c0_11 = arith.constant 0 : index
    %20 = vector.load %arg6[%c0_10, %c0_11] : memref<4x128xf32, #tpu.memory_space<vmem>>, vector<4x128xf32>
    %21 = arith.mulf %4, %4 : vector<4x256xf32>
    %22 = vector.extract_strided_slice %21 {offsets = [0, 0], sizes = [4, 128], strides = [1, 1]} : vector<4x256xf32> to vector<4x128xf32>
    %23 = vector.extract_strided_slice %21 {offsets = [0, 128], sizes = [4, 128], strides = [1, 1]} : vector<4x256xf32> to vector<4x128xf32>
    %24 = arith.addf %22, %23 : vector<4x128xf32>
    %25 = arith.addf %20, %24 : vector<4x128xf32>
    %c0_12 = arith.constant 0 : index
    %c0_13 = arith.constant 0 : index
    %26 = vector.load %arg6[%c0_12, %c0_13] : memref<4x128xf32, #tpu.memory_space<vmem>>, vector<4x128xf32>
    tpu.vector_store %arg6[%c0_12, %c0_13], %25 {strides = array<i32>} : memref<4x128xf32, #tpu.memory_space<vmem>>, vector<4x128xf32>,
    %c0_14 = arith.constant 0 : index
    %c0_15 = arith.constant 0 : index
    %27 = vector.load %arg7[%c0_14, %c0_15] : memref<4x128xf32, #tpu.memory_space<vmem>>, vector<4x128xf32>
    %28 = vector.extract_strided_slice %12 {offsets = [0, 0], sizes = [4, 128], strides = [1, 1]} : vector<4x256xf32> to vector<4x128xf32>
    %29 = vector.extract_strided_slice %12 {offsets = [0, 128], sizes = [4, 128], strides = [1, 1]} : vector<4x256xf32> to vector<4x128xf32>
    %30 = arith.addf %28, %29 : vector<4x128xf32>
    %31 = arith.addf %27, %30 : vector<4x128xf32>
    %c0_16 = arith.constant 0 : index
    %c0_17 = arith.constant 0 : index
    %32 = vector.load %arg7[%c0_16, %c0_17] : memref<4x128xf32, #tpu.memory_space<vmem>>, vector<4x128xf32>
    tpu.vector_store %arg7[%c0_16, %c0_17], %31 {strides = array<i32>} : memref<4x128xf32, #tpu.memory_space<vmem>>, vector<4x128xf32>,
    %c0_i32_18 = arith.constant 0 : i32
    %33 = arith.cmpi eq, %arg1, %c0_i32_18 : i32
    %34 = arith.extui %33 : i1 to i32
    %c0_i32_19 = arith.constant 0 : i32
    %35 = arith.cmpi ne, %34, %c0_i32_19 : i32
    scf.if %35 {
      %c0_20 = arith.constant 0 : index
      %c0_21 = arith.constant 0 : index
      %36 = vector.load %arg5[%c0_20, %c0_21] : memref<4x128xf32, #tpu.memory_space<vmem>>, vector<4x128xf32>
      %cst = arith.constant dense<0.000000e+00> : vector<4xf32>
      %37 = vector.multi_reduction <add>, %36, %cst [1] : vector<4x128xf32> to vector<4xf32>
      %38 = vector.shape_cast %37 : vector<4xf32> to vector<4x1xf32>
      %c0_22 = arith.constant 0 : index
      %c0_23 = arith.constant 0 : index
      %39 = vector.load %arg6[%c0_22, %c0_23] : memref<4x128xf32, #tpu.memory_space<vmem>>, vector<4x128xf32>
      %cst_24 = arith.constant dense<0.000000e+00> : vector<4xf32>
      %40 = vector.multi_reduction <add>, %39, %cst_24 [1] : vector<4x128xf32> to vector<4xf32>
      %41 = vector.shape_cast %40 : vector<4xf32> to vector<4x1xf32>
      %c0_25 = arith.constant 0 : index
      %c0_26 = arith.constant 0 : index
      %42 = vector.load %arg7[%c0_25, %c0_26] : memref<4x128xf32, #tpu.memory_space<vmem>>, vector<4x128xf32>
      %cst_27 = arith.constant dense<0.000000e+00> : vector<4xf32>
      %43 = vector.multi_reduction <add>, %42, %cst_27 [1] : vector<4x128xf32> to vector<4xf32>
      %44 = vector.shape_cast %43 : vector<4xf32> to vector<4x1xf32>
      %45 = tpu.concatenate %38, %41, %44 in 1 : vector<4x1xf32>, vector<4x1xf32>, vector<4x1xf32> -> vector<4x3xf32>
      %c0_28 = arith.constant 0 : index
      %c0_29 = arith.constant 0 : index
      %c0_30 = arith.constant 0 : index
      %46 = vector.load %arg4[%c0_28, %c0_29, %c0_30] : memref<1x4x3xf32, #tpu.memory_space<vmem>>, vector<1x4x3xf32>
      %47 = vector.shape_cast %46 : vector<1x4x3xf32> to vector<4x3xf32>
      %48 = vector.shape_cast %45 : vector<4x3xf32> to vector<1x4x3xf32>
      tpu.vector_store %arg4[%c0_28, %c0_29, %c0_30], %48 {strides = array<i32>} : memref<1x4x3xf32, #tpu.memory_space<vmem>>, vector<1x4x3xf32>,
    } else {
    }
    return
  }
  func.func @transform_0(%arg0: i32, %arg1: i32) -> (i32, i32, i32) {
    %c0_i32 = arith.constant 0 : i32
    %c0_i32_0 = arith.constant 0 : i32
    return %arg0, %c0_i32, %arg1 : i32, i32, i32
  }
  func.func @transform_1(%arg0: i32, %arg1: i32) -> (i32, i32, i32) {
    %c0_i32 = arith.constant 0 : i32
    %c0_i32_0 = arith.constant 0 : i32
    return %arg0, %c0_i32, %arg1 : i32, i32, i32
  }
  func.func @transform_2(%arg0: i32, %arg1: i32) -> (i32, i32, i32) {
    %c0_i32 = arith.constant 0 : i32
    %c0_i32_0 = arith.constant 0 : i32
    %c0_i32_1 = arith.constant 0 : i32
    return %arg0, %c0_i32, %c0_i32_0 : i32, i32, i32
  }
}

</mosaic_0001>

<bundles_post_ra>
// kernel: tpu_custom_call.1
= control target key start
LH: loop header
LB: loop body
LE: loop exit
PB: predicated region body
PF: predicated region fallthrough
CT: control target
= control target key end

     0   :  { %7 = vsyncpa [#allocation6], 0  ;;  %s713_s0 = inlined_call_operand.hbm [shape: f32[2,4,256], index: 0, kind: input, shape index: {}]   ;;  %s714_s1 = inlined_call_operand.hbm [shape: f32[2,1,256], index: 1, kind: input, shape index: {}]   ;;  %s715_s2 = inlined_call_operand.vmem [shape: f32[2,4,3], index: 2, kind: output, shape index: {}]  }
   0x1   :  { %9 = vsyncpa [#allocation6 + $0x1], 0 }
   0x2   :  { %10 = vsyncpa [#allocation8], 0 }
   0x3   :  { %12 = vsyncpa [#allocation8 + $0x1], 0  ;;  %s605_s9 = smov 0   ;;  %s607_s10 = smov 0  }
   0x4   :  { %s609_s11 = smov 0   ;;  %s611_s12 = smov 0  }
   0x5   :  { %s613_s13 = smov 0   ;;  %s615_s14 = smov 0  }
   0x6 LB: > { %s394_s15 = sadd.s32 4294967295, %s587_s14   ;;  %s30_s16 = sadd.s32 1, %s583_s13  ;;  %s587_s14 = sphi %s615_s14, %s18_s14   ;;  %s583_s13 = sphi %s613_s13, %s723_s13   ;;  %s579_s12 = sphi %s611_s12, %s722_s12   ;;  %s575_s11 = sphi %s609_s11, %s721_s11   ;;  %s571_s10 = sphi %s607_s10, %s720_s10   ;;  %s567_s9 = sphi %s605_s9, %s719_s9  }
   0x7   : > { %p32_p0 = scmp.ge.s32.totalorder %s30_s16, 2  ;;  %s39_s17 = sadd.s32 1, %s575_s11 }
   0x8   : > { %p46_p1 = scmp.ne.s32.totalorder %s575_s11, %s571_s10  ;;  %p47_p2 = scmp.eq.s32.totalorder %s587_s14, 0 }
   0x9   : > { %s725_s16 = smov (%p32_p0, %s30_s16), 0  ;;  %p52_p4 = scmp.ne.s32.totalorder %s571_s10, %s567_s9 }
   0xa   : > { %p641_p3 = por %p47_p2, %p46_p1  ;;  %s34_s19 = ssub.s32 %s583_s13, %s725_s16 }
   0xb   : > { %p53_p5 = scmp.eq.s32.totalorder %s394_s15, 0  ;;  %p37_p6 = scmp.eq.s32.totalorder %s34_s19, 0 }
   0xc   : > { %p423_p8 = scmp.lt.s32.totalorder %s587_s14, 2  ;;  %s130_s22 = sand.u32 1, %s575_s11  }
   0xd   : > { %p648_p7 = por %p53_p5, %p52_p4  ;;  %s411_s23 = sshll.u32 %s583_s13, 3 }
   0xe   : > { %s654_s21 = scalar_select %p37_p6, %s575_s11, %s39_s17  }
   0xf   : > { %s398_s24 = sshll.u32 %s130_s22, 3  ;;  %s141_s27 = scalar_lea.hbm %s713_s0, %s411_s23 }
  0x10   : > { %s143_s28 = sshll.u32 %s141_s27, 4  ;;  %s134_s29 = scalar_lea.vmem [#allocation5], %s398_s24  ;;  %s144_s28 = int_to_ptr.hbm [resolvable:$true] %s143_s28 }
  0x11   : > { %s145_s30 = sshll.u32 %s134_s29, 4  ;;  %p663_p9 = pnand %p423_p8, %p641_p3  ;;  %s146_s30 = int_to_ptr.vmem [resolvable:$true] %s145_s30 }
  0x12   : > { %p403_p10 = scmp.ge.s32.totalorder %s587_s14, 1  ;;  %p171_p11 = scmp.lt.s32.totalorder %s587_s14, 3 }
  0x13   : > { %s401_s4 = sshll.u32 %s130_s22, 1  ;;  %s131_s5 = scalar_lea.sflag [#allocation6], %s130_s22 }
  0x14   : > { %419 = dma.hbm_to_vmem [thread:$0]  (!%p663_p9), %s144_s28, 128, %s146_s30, %s131_s5  }
  0x15   : > { %p172_p12 = pnand %p403_p10, %p171_p11  ;;  %s402_s6 = sshll.u32 %s583_s13, 1 }
  0x16   : > { %s156_s7 = scalar_lea.vmem [#allocation7], %s401_s4  ;;  %s162_s17 = scalar_lea.hbm %s714_s1, %s402_s6 }
  0x17   : > { %s166_s8 = sshll.u32 %s156_s7, 4  ;;  %s164_s18 = sshll.u32 %s162_s17, 4  ;;  %s167_s8 = int_to_ptr.vmem [resolvable:$true] %s166_s8  ;;  %s165_s18 = int_to_ptr.hbm [resolvable:$true] %s164_s18 }
  0x18   : > { %s153_s19 = scalar_lea.sflag [#allocation8], %s130_s22  ;;  %175 = sbr.rel (%p172_p12) target bundleno = 188 (0xbc), region = 28 }
  0x19   : > { %422 = dma.hbm_to_vmem [thread:$0]  (!%p663_p9), %s165_s18, 32, %s167_s8, %s153_s19  }
  0x1a   : > { %s177_s23 = sand.u32 (!%p172_p12), 1, %s571_s10  }
  0x1b   : > { %s404_s24 = sshll.u32 (!%p172_p12), %s177_s23, 3  ;;  %s178_s25 = scalar_lea.sflag (!%p172_p12), [#allocation6], %s177_s23 }
  0x1c   : > { %s181_s26 = scalar_lea.vmem (!%p172_p12), [#allocation5], %s404_s24 }
  0x1d   : > { %558 = dma.done.wait (%p648_p7), %s178_s25, 128  }
  0x1e   : > { %560 = vsyncadd (%p648_p7), %s178_s25, 4294967168  ;;  %s405_s27 = sshll.u32 %s177_s23, 1  ;;  %s188_s28 = scalar_lea.sflag [#allocation8], %s177_s23 }
  0x1f   : > { %s191_s29 = scalar_lea.vmem [#allocation7], %s405_s27 }
  0x20   : > { %562 = dma.done.wait (%p648_p7), %s188_s28, 32  }
  0x21   : > { %564 = vsyncadd (%p648_p7), %s188_s28, 4294967264  ;;  %v232_v0 = vlaneseq  ;;  %v589_v1 = vmov 0.0   ;;  %v230_v4 = vld [vmem:[%s181_s26] sm:$0xff]  ;;  %v231_v5 = vld [vmem:[%s191_s29] sm:$0x3]  ;;  %vm250_vm2 = vcmask 1043456  }
  0x22   : > { %227 = vst [vmem:[#allocation2] sm:$0xf] %v589_v1  ;;  %v236_v6 = vperm.slane %v231_v5, 0  ;;  %v237_v7 = vperm.slane %v231_v5, 1  ;;  %v261_v8 = vmul.f32 %v230_v4, %v230_v4  ;;  %p219_p13 = scmp.lt.s32.totalorder %s579_s12, 1  ;;  %vm287_vm3 = vcmask 7168  }
  0x23   : > { %228 = vst [vmem:[#allocation3] sm:$0xf] %v589_v1  ;;  %v233_v2 = vshrl.u32 %v232_v0, 7  ;;  %vm289_vm4 = vcmask 15360   ;;  %vm291_vm5 = vcmask 19456  }
  0x24   : > { %229 = vst [vmem:[#allocation4] sm:$0xf] %v589_v1  ;;  %v263_v9 = vrot.slane %v261_v8, 4  ;;  %s727_s12 = smov (!%p219_p13, %s579_s12), 1 }
  0x25   : > { %v234_v3 = vcvt.s32.f32 %v233_v2  ;;  %s406_s20 = sshll.u32 %s727_s12, 2 }
  0x26   : > { %v265_v15 = vadd.f32 %v263_v9, %v261_v8  ;;  %s222_s3 = scalar_lea.vmem %s715_s2, %s406_s20 }
  0x27   : > { %vm240_vm0 = vcmp.eq.f32.partialorder %v236_v6, %v234_v3  ;;  %vm241_vm1 = vcmp.eq.f32.partialorder %v237_v7, %v234_v3 }
  0x28   : > { %v407_v10 = vsel %vm240_vm0, 1.0, %v589_v1  ;;  %v408_v11 = vsel %vm241_vm1, 1.0, %v589_v1 }
  0x29   : > { %v249_v14 = vrot.slane %v408_v11, 4  ;;  %v269_v16 = vadd.f32 %v408_v11, %v407_v10  ;;  %v246_v22 = vld [vmem:[#allocation2] sm:$0xf] }
  0x2a   : > { %v260_v12 = vld [vmem:[#allocation3] sm:$0xf] }
  0x2b   : > { %v268_v13 = vld [vmem:[#allocation4] sm:$0xf]  ;;  %v251_v17 = vsel %vm250_vm2, %v407_v10, %v249_v14  ;;  %v266_v18 = vadd.f32 %v265_v15, %v260_v12 }
  0x2c   : > { %v270_v19 = vadd.f32 %v269_v16, %v268_v13  ;;  %v253_v20 = vmul.f32 %v251_v17, %v230_v4 }
  0x2d   : > { %267 = vst [vmem:[#allocation3] sm:$0xf] %v266_v18 }
  0x2e   : > { %v255_v21 = vrot.slane %v253_v20, 4  ;;  %271 = vst [vmem:[#allocation4] sm:$0xf] %v270_v19 }
  0x30   : > { %v257_v23 = vadd.f32 %v255_v21, %v253_v20 }
  0x32   : > { %v258_v24 = vadd.f32 %v257_v23, %v246_v22 }
  0x34   : > { %259 = vst [vmem:[#allocation2] sm:$0xf] %v258_v24  ;;  %v279_v29 = vld [vmem:[#allocation3] sm:$0xf] }
  0x35   : > { %v283_v25 = vld [vmem:[#allocation4] sm:$0xf]  ;;  %v280_v30 = vsel %vm250_vm2, %v279_v29, 0.0 }
  0x36   : > { %v284_v26 = vsel %vm250_vm2, %v283_v25, 0.0 }
  0x37   : > { %285 = vadd.xlane.f32.xlu1 %v284_v26 }
  0x3b   : > { %v275_v27 = vld [vmem:[#allocation2] sm:$0xf] }
  0x3c   : > { %v276_v28 = vsel %vm250_vm2, %v275_v27, 0.0 }
  0x3d   : > { %277 = vadd.xlane.f32.xlu0 %v276_v28 }
  0x45   : > { %281 = vadd.xlane.f32.xlu0 %v280_v30 }
  0xaa   : > { %v286_v32 = vpop.xlane.xlu1 %285 }
  0xb0   : > { %v278_v31 = vpop.xlane.xlu0 %277 }
  0xb8   : > { %v282_v33 = vpop.xlane.xlu0 %281 }
  0xb9   : > { %v288_v34 = vsel %vm287_vm3, %v278_v31, %v282_v33 }
  0xba   : > { %v290_v35 = vsel %vm289_vm4, %v288_v34, %v286_v32 }
  0xbb   : > { %292 = vst.msk [vmem:[%s222_s3] sm:$0xf] %vm291_vm5, %v290_v35 }
  0xbc PF: > { %s18_s14 = sadd.s32 1, %s587_s14   ;;  %s719_s9 = smov %s571_s10 }
  0xbd   : > { %p15_p0 = scmp.ge.s32.totalorder %s18_s14, 4   ;;  %s720_s10 = smov %s575_s11 }
  0xbe   : > { %s721_s11 = smov %s654_s21  ;;  %s722_s12 = smov %s583_s13 }
  0xbf   : > { %s723_s13 = smov %s725_s16  ;;  %17 = sbr.rel (!%p15_p0) target bundleno = 6 (0x6), region = 89 }
  0xc4   :  { %312 = vsyncpa [#allocation6], 1 }
  0xc5   :  { %314 = vsyncpa [#allocation6 + $0x1], 1 }
  0xc6   :  { %315 = vsyncpa [#allocation8], 1 }
  0xc7   :  { %317 = vsyncpa [#allocation8 + $0x1], 1 }

</bundles_post_ra>
